<compile_context>
chip_gen: v7x
topology: tpu7x:2x2x1
jax: 0.10.0
libtpu: 0.0.40
codegen_flags: <defaults>
</compile_context>

<pallas_src>
import functools

import jax
import jax.numpy as jnp
import numpy as np
from jax.experimental import pallas as pl
from jax.experimental.pallas import tpu as pltpu

# ----------------------------- static config --------------------------------
NUM_CHANNELS = 8
KERNEL_SIZES = (3, 3)
DILATIONS = (1, 2)
OUT_CHANNELS = (8, 8)
COMBINE_RESIDUALS = "add"
LEAKY_SLOPE = 0.01          # nn.LeakyReLU default
BN_EPS = 1e-5               # nn.BatchNorm1d default

BUF_LENGTHS = tuple((k - 1) * d for k, d in zip(KERNEL_SIZES, DILATIONS))
BUF_INDICES = [0]
for _i in range(len(KERNEL_SIZES) - 1):
    BUF_INDICES.append(BUF_INDICES[-1] + BUF_LENGTHS[_i])
BUF_INDICES = tuple(BUF_INDICES)
TOTAL_BUF = sum(BUF_LENGTHS)
CTX_HEIGHT = max(OUT_CHANNELS)
NUM_LAYERS = len(KERNEL_SIZES)
CIN_LIST = (NUM_CHANNELS,) + OUT_CHANNELS[:-1]

COUT_MAX = max(OUT_CHANNELS)
KC_MAX = max(k * c for k, c in zip(KERNEL_SIZES, CIN_LIST))
KC_PAD = ((KC_MAX + 1 + 7) // 8) * 8   # im2col K (+1 bias col), padded to sublanes

# MXU operand dtype.  bf16 hits the full MXU rate on v6e/v7x (and is cheaper on
# v5e too); accumulation stays f32 and all elementwise math / cache stores stay
# f32 (v5e has no bf16 VPU/EUP).  Set to jnp.float32 for bit-tight numerics.
MXU_DTYPE = jnp.bfloat16

# --- static safety checks (per review) ---------------------------------------
# The per-layer cache slices must exactly tile [0, TOTAL_BUF) and cover all
# CTX_HEIGHT rows.  This makes the per-layer updates a *full* overwrite of the
# cache (so the old upfront whole-cache copy was dead work and is removed) and
# makes the ctx input->output aliasing read/write ranges hazard-free.
assert BUF_INDICES[0] == 0
for _i in range(NUM_LAYERS - 1):
    assert BUF_INDICES[_i + 1] == BUF_INDICES[_i] + BUF_LENGTHS[_i]
assert BUF_INDICES[-1] + BUF_LENGTHS[-1] == TOTAL_BUF
for _i in range(NUM_LAYERS):
    assert CIN_LIST[_i] == CTX_HEIGHT, "cache rows must cover every layer input"
if COMBINE_RESIDUALS in ("add", "multiply"):
    for _i in range(NUM_LAYERS):
        assert CIN_LIST[_i] == OUT_CHANNELS[_i], "residual combine needs cin == cout"


# ------------------------------- Pallas kernel -------------------------------
def _roll_lanes(v, shift):
    """result[..., l] = v[..., (l - shift) % L]  (static shift, two-slice concat)."""
    length = v.shape[-1]
    shift = shift % length
    if shift == 0:
        return v
    return jnp.concatenate([v[..., length - shift:], v[..., :length - shift]], axis=-1)


def cached_convnet_kernel(x_ref, ctx_ref, w_ref, x_out_ref, ctx_out_ref, *,
                          b_tile, t):
    """Fused all-layer forward for one tile of B_TILE batch elements.

    Lane layout: every 2-D slab is (channels, B_TILE*T); the lane axis is
    batch-major / time-minor, so batch element b owns lanes [b*T, (b+1)*T).

    x_ref       : (C_in, B_TILE*T)        current frames
    ctx_ref     : (CTX_HEIGHT, B_TILE*T)  cached left context in "spread" form:
                                          lanes [b*T, b*T+TOTAL_BUF) hold
                                          ctx[b, :, :]; the rest is padding
    w_ref       : (NUM_LAYERS, COUT_MAX, KC_PAD)  BN-folded im2col weights;
                                          column k*cin holds the folded bias
    x_out_ref   : (C_out, B_TILE*T)
    ctx_out_ref : (CTX_HEIGHT, B_TILE*T)  updated cache, same spread layout
    """
    lanes = b_tile * t
    # Time index of every lane within its batch segment.
    t_idx = jax.lax.broadcasted_iota(jnp.int32, (CTX_HEIGHT, lanes), 1) % t

    x = x_ref[...].astype(jnp.float32)                      # (C_in, lanes)
    ctx = ctx_ref[...].astype(jnp.float32)                  # (CTX_HEIGHT, lanes)
    ctx_new = jnp.zeros((CTX_HEIGHT, lanes), jnp.float32)   # composed cache image

    for i in range(NUM_LAYERS):
        k, d = KERNEL_SIZES[i], DILATIONS[i]
        buf_len, s = BUF_LENGTHS[i], BUF_INDICES[i]
        cin, cout = CIN_LIST[i], OUT_CHANNELS[i]

        # ---- streaming cache update: the next call's left context for layer i
        # is the last buf_len samples of this layer's input (T >= buf_len,
        # asserted in the wrapper).  Composed into ctx_new (disjoint lane
        # ranges per layer) and stored once, lane-dense, at the end.
        upd = _roll_lanes(x, -(t - buf_len - s))
        ctx_new = jnp.where((t_idx >= s) & (t_idx < s + buf_len), upd, ctx_new)

        # ---- im2col: tap kk of the dilated causal conv is x shifted right by
        # shift = buf_len - kk*d within each batch segment, with the first
        # `shift` lanes of each segment patched from the cached left context.
        taps = []
        for kk in range(k):
            shift = buf_len - kk * d
            if shift == 0:
                taps.append(x)
            else:
                x_sh = _roll_lanes(x, shift)
                ctx_sh = _roll_lanes(ctx, -(s + kk * d))
                taps.append(jnp.where(t_idx < shift, ctx_sh, x_sh))
        # Filler rows up to KC_PAD: row k*cin is the ones row matched with the
        # folded-bias column; the remaining rows meet all-zero weight columns.
        taps.append(jnp.ones((KC_PAD - k * cin, lanes), jnp.float32))
        col = jnp.concatenate(taps, axis=0)                  # (KC_PAD, lanes)

        # ---- Conv1d + folded BatchNorm + bias: ONE MXU matmul per layer,
        # N = B_TILE*T lanes, MXU_DTYPE operands, f32 accumulation.
        w2d = w_ref[i, :cout, :]                             # (cout, KC_PAD)
        y = jnp.dot(w2d, col.astype(w2d.dtype),
                    preferred_element_type=jnp.float32)      # (cout, lanes) f32

        # Dropout1d(p=0.0) -> identity.  LeakyReLU(0.01) in f32.
        y = jnp.where(y >= 0, y, LEAKY_SLOPE * y)

        if COMBINE_RESIDUALS == "add":
            x = x + y
        elif COMBINE_RESIDUALS == "multiply":
            x = x * y
        else:
            x = y

    # Lane-dense, unmasked stores.
    x_out_ref[...] = x.astype(x_out_ref.dtype)
    ctx_out_ref[...] = ctx_new.astype(ctx_out_ref.dtype)


# ------------------------------ param packing --------------------------------
def fold_and_pack_params(params, mxu_dtype):
    """Fold eval-mode BatchNorm into the conv weights and pack one slab.

    Returns (NUM_LAYERS, COUT_MAX, KC_PAD); column k*cin holds the folded bias
    (matched in-kernel by the ones row appended to the im2col matrix).
    """
    w_slab = jnp.zeros((NUM_LAYERS, COUT_MAX, KC_PAD), jnp.float32)
    for i, p in enumerate(params):
        k, cin, cout = KERNEL_SIZES[i], CIN_LIST[i], OUT_CHANNELS[i]
        scale = p["gamma"][:, 0] * jax.lax.rsqrt(p["var"][:, 0] + BN_EPS)   # (cout,)
        w_eff = p["w"] * scale[:, None, None]                               # (cout,cin,k)
        b_eff = (p["b"][:, 0] - p["mean"][:, 0]) * scale + p["beta"][:, 0]  # (cout,)
        # tap-major (kk) / channel-minor flattening matches the kernel's
        # tap-stacking order in `col`.
        w2d = jnp.transpose(w_eff, (0, 2, 1)).reshape(cout, k * cin)
        w_slab = w_slab.at[i, :cout, :k * cin].set(w2d)
        w_slab = w_slab.at[i, :cout, k * cin].set(b_eff)
    return w_slab.astype(mxu_dtype)


def cached_convnet_forward(x, ctx, params, *, b_tile=8, mxu_dtype=MXU_DTYPE):
    """Wrapper: folds BN, packs params, reshapes to lane-dense tiles, launches.

    The grid runs over batch tiles of B_TILE elements; each grid step runs the
    whole network on a (C, B_TILE*T) lane-dense slab (matmul N dim = B_TILE*T).
    For frame-by-frame streaming, amortize dispatch further by passing more
    frames per call (larger T) and/or keeping x/ctx in this lane-dense layout
    between calls instead of converting every step.
    """
    B, C, T = x.shape
    assert C == NUM_CHANNELS
    assert B % b_tile == 0, "choose/pad b_tile so it divides the batch"
    assert T >= TOTAL_BUF, "per-call frame count must cover the cache length"
    num_tiles = B // b_tile
    lanes = b_tile * T

    w_slab = fold_and_pack_params(params, mxu_dtype)

    # Lane-dense layout plumbing (tiny; outside the kernel):
    #   x  : (tile, C, B_TILE*T), batch-major / time-minor lanes
    #   ctx: (tile, CTX_HEIGHT, B_TILE*T), each batch segment holds its
    #        TOTAL_BUF cache columns at the segment head, zero-padded to T.
    x_l = (x.reshape(num_tiles, b_tile, C, T)
            .transpose(0, 2, 1, 3).reshape(num_tiles, C, lanes))
    ctx_l = (ctx.reshape(num_tiles, b_tile, CTX_HEIGHT, TOTAL_BUF)
                .transpose(0, 2, 1, 3))
    ctx_l = jnp.pad(ctx_l, ((0, 0), (0, 0), (0, 0), (0, T - TOTAL_BUF)))
    ctx_l = ctx_l.reshape(num_tiles, CTX_HEIGHT, lanes)

    kernel = functools.partial(cached_convnet_kernel, b_tile=b_tile, t=T)

    # VMEM per grid step: ~4 lane-dense (8, lanes) f32 slabs (double-buffered)
    # plus the tiny weight slab -- well under the 32 MiB scoped default on
    # v5e/v6e/v7x even for thousands of lanes, so no vmem_limit override.
    x_out_l, ctx_out_l = pl.pallas_call(
        kernel,
        grid=(num_tiles,),
        in_specs=[
            pl.BlockSpec((None, C, lanes), lambda i: (i, 0, 0)),
            pl.BlockSpec((None, CTX_HEIGHT, lanes), lambda i: (i, 0, 0)),
            pl.BlockSpec((NUM_LAYERS, COUT_MAX, KC_PAD), lambda i: (0, 0, 0)),
        ],
        out_specs=(
            pl.BlockSpec((None, OUT_CHANNELS[-1], lanes), lambda i: (i, 0, 0)),
            pl.BlockSpec((None, CTX_HEIGHT, lanes), lambda i: (i, 0, 0)),
        ),
        out_shape=(
            jax.ShapeDtypeStruct((num_tiles, OUT_CHANNELS[-1], lanes), x.dtype),
            jax.ShapeDtypeStruct((num_tiles, CTX_HEIGHT, lanes), ctx.dtype),
        ),
        input_output_aliases={1: 1},   # streaming cache: ctx in -> ctx out
        compiler_params=pltpu.CompilerParams(
            dimension_semantics=("parallel",)),   # batch tiles across v7x TCs
    )(x_l, ctx_l, w_slab)

    x_out = (x_out_l.reshape(num_tiles, OUT_CHANNELS[-1], b_tile, T)
                     .transpose(0, 2, 1, 3).reshape(B, OUT_CHANNELS[-1], T))
    ctx_out = (ctx_out_l.reshape(num_tiles, CTX_HEIGHT, b_tile, T)[..., :TOTAL_BUF]
                        .transpose(0, 2, 1, 3).reshape(B, CTX_HEIGHT, TOTAL_BUF))
    return x_out, ctx_out


# ---------------------------- pure-JAX reference -----------------------------
def reference_forward(x, ctx, params):
    x = x.astype(jnp.float32)
    ctx = ctx.astype(jnp.float32)
    for i in range(NUM_LAYERS):
        p = params[i]
        k, d = KERNEL_SIZES[i], DILATIONS[i]
        buf_len, s = BUF_LENGTHS[i], BUF_INDICES[i]
        cin = x.shape[1]
        T = x.shape[-1]
        conv_in = jnp.concatenate([ctx[:, :cin, s:s + buf_len], x], axis=-1)
        ctx = ctx.at[:, :cin, s:s + buf_len].set(conv_in[..., -buf_len:])
        acc = jnp.zeros((x.shape[0], OUT_CHANNELS[i], T), jnp.float32)
        for kk in range(k):
            tap = conv_in[..., kk * d: kk * d + T]
            acc = acc + jnp.einsum("oi,bit->bot", p["w"][:, :, kk], tap)
        y = acc + p["b"][None, :, :]
        y = (y - p["mean"][None, :, :]) * jax.lax.rsqrt(p["var"][None, :, :] + BN_EPS) \
            * p["gamma"][None, :, :] + p["beta"][None, :, :]
        y = jnp.where(y >= 0, y, LEAKY_SLOPE * y)
        x = x + y if COMBINE_RESIDUALS == "add" else (
            x * y if COMBINE_RESIDUALS == "multiply" else y)
    return x, ctx


# ---------------------------------- main --------------------------------------
def make_params(key):
    params = []
    for i in range(NUM_LAYERS):
        cin = NUM_CHANNELS if i == 0 else OUT_CHANNELS[i - 1]
        cout = OUT_CHANNELS[i]
        k = KERNEL_SIZES[i]
        key, *ks = jax.random.split(key, 7)
        params.append(dict(
            w=0.1 * jax.random.normal(ks[0], (cout, cin, k), jnp.float32),
            b=0.05 * jax.random.normal(ks[1], (cout, 1), jnp.float32),
            gamma=1.0 + 0.1 * jax.random.normal(ks[2], (cout, 1), jnp.float32),
            beta=0.05 * jax.random.normal(ks[3], (cout, 1), jnp.float32),
            mean=0.1 * jax.random.normal(ks[4], (cout, 1), jnp.float32),
            var=1.0 + 0.1 * jnp.abs(jax.random.normal(ks[5], (cout, 1), jnp.float32)),
        ))
    return params, key


if __name__ == "__main__":
    B, T = 16, 16          # 2 batch tiles of 8 -> 128 lanes per grid step
    key = jax.random.PRNGKey(0)
    params, key = make_params(key)
    key, kx, kc = jax.random.split(key, 3)
    x = jax.random.normal(kx, (B, NUM_CHANNELS, T), jnp.float32)
    # init_ctx_buf would give zeros; use non-zero values to exercise the cache.
    ctx = 0.5 * jax.random.normal(kc, (B, CTX_HEIGHT, TOTAL_BUF), jnp.float32)

    x_ref_out, ctx_ref_out = reference_forward(x, ctx, params)

    # Production config: bf16 MXU operands, f32 accumulation / elementwise.
    # Tolerance accounts for bf16 operand rounding only.
    x_out, ctx_out = cached_convnet_forward(x, ctx, params, b_tile=8)
    jax.block_until_ready((x_out, ctx_out))
    assert np.allclose(np.asarray(x_out), np.asarray(x_ref_out), rtol=5e-2, atol=5e-2)
    assert np.allclose(np.asarray(ctx_out), np.asarray(ctx_ref_out), rtol=5e-2, atol=5e-2)

    # Exact path: f32 MXU operands must match the f32 reference tightly.
    x_out32, ctx_out32 = cached_convnet_forward(
        x, ctx, params, b_tile=8, mxu_dtype=jnp.float32)
    jax.block_until_ready((x_out32, ctx_out32))
    assert np.allclose(np.asarray(x_out32), np.asarray(x_ref_out), rtol=1e-4, atol=1e-5)
    assert np.allclose(np.asarray(ctx_out32), np.asarray(ctx_ref_out), rtol=1e-4, atol=1e-5)

    print("KERNEL_OK")
</pallas_src>

<mosaic_0001>
module attributes {stable_mosaic.version = 11 : i64} {
  func.func @cached_convnet_kernel(%arg0: i32, %arg1: memref<1x8x128xf32, #tpu.memory_space<vmem>>, %arg2: memref<1x8x128xf32, #tpu.memory_space<vmem>>, %arg3: memref<2x8x32xbf16, #tpu.memory_space<vmem>>, %arg4: memref<1x8x128xf32, #tpu.memory_space<vmem>>, %arg5: memref<1x8x128xf32, #tpu.memory_space<vmem>>) attributes {dimension_semantics = [#tpu.dimension_semantics<parallel>], iteration_bounds = array<i64: 2>, scalar_prefetch = 0 : i64, scratch_operands = 0 : i64, tpu.core_type = #tpu.core_type<tc>, window_params = [{transform_indices = @transform_0, window_bounds = array<i64: 1, 8, 128>}, {transform_indices = @transform_1, window_bounds = array<i64: 1, 8, 128>}, {pipeline_mode = #tpu.pipeline_mode<synchronous>, transform_indices = @transform_2, window_bounds = array<i64: 2, 8, 32>}, {transform_indices = @transform_3, window_bounds = array<i64: 1, 8, 128>}, {transform_indices = @transform_4, window_bounds = array<i64: 1, 8, 128>}]} {
    %0 = tpu.iota {dimensions = array<i32: 1>} : vector<8x128xi32>
    %c16_i32 = arith.constant 16 : i32
    %c0_i32 = arith.constant 0 : i32
    %1 = arith.cmpi eq, %c16_i32, %c0_i32 : i32
    %c1_i32 = arith.constant 1 : i32
    %2 = arith.select %1, %c1_i32, %c16_i32 : i32
    %3 = vector.broadcast %2 : i32 to vector<8x128xi32>
    %4 = arith.remsi %0, %3 : vector<8x128xi32>
    %c0_i32_0 = arith.constant 0 : i32
    %5 = vector.broadcast %c0_i32_0 : i32 to vector<8x128xi32>
    %6 = arith.cmpi ne, %4, %5 : vector<8x128xi32>
    %c0_i32_1 = arith.constant 0 : i32
    %7 = vector.broadcast %c0_i32_1 : i32 to vector<8x128xi32>
    %8 = arith.cmpi slt, %4, %7 : vector<8x128xi32>
    %c0_i32_2 = arith.constant 0 : i32
    %9 = arith.cmpi slt, %2, %c0_i32_2 : i32
    %10 = vector.broadcast %9 : i1 to vector<8x128xi1>
    %11 = vector.broadcast %10 : vector<8x128xi1> to vector<8x128xi1>
    %12 = arith.xori %8, %11 : vector<8x128xi1>
    %13 = arith.andi %12, %6 : vector<8x128xi1>
    %14 = vector.broadcast %2 : i32 to vector<8x128xi32>
    %15 = arith.addi %4, %14 : vector<8x128xi32>
    %16 = arith.select %13, %15, %4 : vector<8x128xi1>, vector<8x128xi32>
    %c0 = arith.constant 0 : index
    %c0_3 = arith.constant 0 : index
    %c0_4 = arith.constant 0 : index
    %17 = vector.load %arg1[%c0, %c0_3, %c0_4] : memref<1x8x128xf32, #tpu.memory_space<vmem>>, vector<1x8x128xf32>
    %18 = vector.shape_cast %17 : vector<1x8x128xf32> to vector<8x128xf32>
    %c0_5 = arith.constant 0 : index
    %c0_6 = arith.constant 0 : index
    %c0_7 = arith.constant 0 : index
    %19 = vector.load %arg2[%c0_5, %c0_6, %c0_7] : memref<1x8x128xf32, #tpu.memory_space<vmem>>, vector<1x8x128xf32>
    %20 = vector.shape_cast %19 : vector<1x8x128xf32> to vector<8x128xf32>
    %cst = arith.constant 0.000000e+00 : f32
    %21 = vector.broadcast %cst : f32 to vector<8x128xf32>
    %22 = vector.extract_strided_slice %18 {offsets = [0, 14], sizes = [8, 114], strides = [1, 1]} : vector<8x128xf32> to vector<8x114xf32>
    %23 = vector.extract_strided_slice %18 {offsets = [0, 0], sizes = [8, 14], strides = [1, 1]} : vector<8x128xf32> to vector<8x14xf32>
    %24 = tpu.concatenate %22, %23 in 1 : vector<8x114xf32>, vector<8x14xf32> -> vector<8x128xf32>
    %c0_i32_8 = arith.constant 0 : i32
    %25 = vector.broadcast %c0_i32_8 : i32 to vector<8x128xi32>
    %26 = arith.cmpi sge, %16, %25 : vector<8x128xi32>
    %c2_i32 = arith.constant 2 : i32
    %27 = vector.broadcast %c2_i32 : i32 to vector<8x128xi32>
    %28 = arith.cmpi slt, %16, %27 : vector<8x128xi32>
    %29 = arith.andi %26, %28 : vector<8x128xi1>
    %30 = arith.select %29, %24, %21 : vector<8x128xi1>, vector<8x128xf32>
    %31 = vector.extract_strided_slice %18 {offsets = [0, 126], sizes = [8, 2], strides = [1, 1]} : vector<8x128xf32> to vector<8x2xf32>
    %32 = vector.extract_strided_slice %18 {offsets = [0, 0], sizes = [8, 126], strides = [1, 1]} : vector<8x128xf32> to vector<8x126xf32>
    %33 = tpu.concatenate %31, %32 in 1 : vector<8x2xf32>, vector<8x126xf32> -> vector<8x128xf32>
    %c2_i32_9 = arith.constant 2 : i32
    %34 = vector.broadcast %c2_i32_9 : i32 to vector<8x128xi32>
    %35 = arith.cmpi slt, %16, %34 : vector<8x128xi32>
    %36 = arith.select %35, %20, %33 : vector<8x128xi1>, vector<8x128xf32>
    %37 = vector.extract_strided_slice %18 {offsets = [0, 127], sizes = [8, 1], strides = [1, 1]} : vector<8x128xf32> to vector<8x1xf32>
    %38 = vector.extract_strided_slice %18 {offsets = [0, 0], sizes = [8, 127], strides = [1, 1]} : vector<8x128xf32> to vector<8x127xf32>
    %39 = tpu.concatenate %37, %38 in 1 : vector<8x1xf32>, vector<8x127xf32> -> vector<8x128xf32>
    %40 = vector.extract_strided_slice %20 {offsets = [0, 1], sizes = [8, 127], strides = [1, 1]} : vector<8x128xf32> to vector<8x127xf32>
    %41 = vector.extract_strided_slice %20 {offsets = [0, 0], sizes = [8, 1], strides = [1, 1]} : vector<8x128xf32> to vector<8x1xf32>
    %42 = tpu.concatenate %40, %41 in 1 : vector<8x127xf32>, vector<8x1xf32> -> vector<8x128xf32>
    %c1_i32_10 = arith.constant 1 : i32
    %43 = vector.broadcast %c1_i32_10 : i32 to vector<8x128xi32>
    %44 = arith.cmpi slt, %16, %43 : vector<8x128xi32>
    %45 = arith.select %44, %42, %39 : vector<8x128xi1>, vector<8x128xf32>
    %cst_11 = arith.constant 1.000000e+00 : f32
    %46 = vector.broadcast %cst_11 : f32 to vector<8x128xf32>
    %47 = tpu.concatenate %36, %45, %18, %46 in 0 : vector<8x128xf32>, vector<8x128xf32>, vector<8x128xf32>, vector<8x128xf32> -> vector<32x128xf32>
    %c0_12 = arith.constant 0 : index
    %c0_13 = arith.constant 0 : index
    %c0_14 = arith.constant 0 : index
    %48 = vector.load %arg3[%c0_12, %c0_13, %c0_14] : memref<2x8x32xbf16, #tpu.memory_space<vmem>>, vector<1x8x32xbf16>
    %49 = vector.shape_cast %48 : vector<1x8x32xbf16> to vector<8x32xbf16>
    %50 = arith.truncf %47 : vector<32x128xf32> to vector<32x128xbf16>
    %cst_15 = arith.constant dense<0.000000e+00> : vector<8x128xf32>
    %51 = tpu.matmul %49, %50, %cst_15 {dimension_numbers = #tpu.dot_dimension_numbers<[1], [0], [0], [1], [0, 0, 1, 1], [], []>} : vector<8x32xbf16>, vector<32x128xbf16>, vector<8x128xf32> -> vector<8x128xf32>
    %cst_16 = arith.constant 0.000000e+00 : f32
    %52 = vector.broadcast %cst_16 : f32 to vector<8x128xf32>
    %53 = arith.cmpf oge, %51, %52 : vector<8x128xf32>
    %cst_17 = arith.constant 0.00999999977 : f32
    %54 = vector.broadcast %cst_17 : f32 to vector<8x128xf32>
    %55 = arith.mulf %54, %51 : vector<8x128xf32>
    %56 = arith.select %53, %51, %55 : vector<8x128xi1>, vector<8x128xf32>
    %57 = arith.addf %18, %56 : vector<8x128xf32>
    %58 = vector.extract_strided_slice %57 {offsets = [0, 10], sizes = [8, 118], strides = [1, 1]} : vector<8x128xf32> to vector<8x118xf32>
    %59 = vector.extract_strided_slice %57 {offsets = [0, 0], sizes = [8, 10], strides = [1, 1]} : vector<8x128xf32> to vector<8x10xf32>
    %60 = tpu.concatenate %58, %59 in 1 : vector<8x118xf32>, vector<8x10xf32> -> vector<8x128xf32>
    %c2_i32_18 = arith.constant 2 : i32
    %61 = vector.broadcast %c2_i32_18 : i32 to vector<8x128xi32>
    %62 = arith.cmpi sge, %16, %61 : vector<8x128xi32>
    %c6_i32 = arith.constant 6 : i32
    %63 = vector.broadcast %c6_i32 : i32 to vector<8x128xi32>
    %64 = arith.cmpi slt, %16, %63 : vector<8x128xi32>
    %65 = arith.andi %62, %64 : vector<8x128xi1>
    %66 = arith.select %65, %60, %30 : vector<8x128xi1>, vector<8x128xf32>
    %67 = vector.extract_strided_slice %57 {offsets = [0, 124], sizes = [8, 4], strides = [1, 1]} : vector<8x128xf32> to vector<8x4xf32>
    %68 = vector.extract_strided_slice %57 {offsets = [0, 0], sizes = [8, 124], strides = [1, 1]} : vector<8x128xf32> to vector<8x124xf32>
    %69 = tpu.concatenate %67, %68 in 1 : vector<8x4xf32>, vector<8x124xf32> -> vector<8x128xf32>
    %70 = vector.extract_strided_slice %20 {offsets = [0, 2], sizes = [8, 126], strides = [1, 1]} : vector<8x128xf32> to vector<8x126xf32>
    %71 = vector.extract_strided_slice %20 {offsets = [0, 0], sizes = [8, 2], strides = [1, 1]} : vector<8x128xf32> to vector<8x2xf32>
    %72 = tpu.concatenate %70, %71 in 1 : vector<8x126xf32>, vector<8x2xf32> -> vector<8x128xf32>
    %c4_i32 = arith.constant 4 : i32
    %73 = vector.broadcast %c4_i32 : i32 to vector<8x128xi32>
    %74 = arith.cmpi slt, %16, %73 : vector<8x128xi32>
    %75 = arith.select %74, %72, %69 : vector<8x128xi1>, vector<8x128xf32>
    %76 = vector.extract_strided_slice %57 {offsets = [0, 126], sizes = [8, 2], strides = [1, 1]} : vector<8x128xf32> to vector<8x2xf32>
    %77 = vector.extract_strided_slice %57 {offsets = [0, 0], sizes = [8, 126], strides = [1, 1]} : vector<8x128xf32> to vector<8x126xf32>
    %78 = tpu.concatenate %76, %77 in 1 : vector<8x2xf32>, vector<8x126xf32> -> vector<8x128xf32>
    %79 = vector.extract_strided_slice %20 {offsets = [0, 4], sizes = [8, 124], strides = [1, 1]} : vector<8x128xf32> to vector<8x124xf32>
    %80 = vector.extract_strided_slice %20 {offsets = [0, 0], sizes = [8, 4], strides = [1, 1]} : vector<8x128xf32> to vector<8x4xf32>
    %81 = tpu.concatenate %79, %80 in 1 : vector<8x124xf32>, vector<8x4xf32> -> vector<8x128xf32>
    %c2_i32_19 = arith.constant 2 : i32
    %82 = vector.broadcast %c2_i32_19 : i32 to vector<8x128xi32>
    %83 = arith.cmpi slt, %16, %82 : vector<8x128xi32>
    %84 = arith.select %83, %81, %78 : vector<8x128xi1>, vector<8x128xf32>
    %cst_20 = arith.constant 1.000000e+00 : f32
    %85 = vector.broadcast %cst_20 : f32 to vector<8x128xf32>
    %86 = tpu.concatenate %75, %84, %57, %85 in 0 : vector<8x128xf32>, vector<8x128xf32>, vector<8x128xf32>, vector<8x128xf32> -> vector<32x128xf32>
    %c1 = arith.constant 1 : index
    %c0_21 = arith.constant 0 : index
    %c0_22 = arith.constant 0 : index
    %87 = vector.load %arg3[%c1, %c0_21, %c0_22] : memref<2x8x32xbf16, #tpu.memory_space<vmem>>, vector<1x8x32xbf16>
    %88 = vector.shape_cast %87 : vector<1x8x32xbf16> to vector<8x32xbf16>
    %89 = arith.truncf %86 : vector<32x128xf32> to vector<32x128xbf16>
    %cst_23 = arith.constant dense<0.000000e+00> : vector<8x128xf32>
    %90 = tpu.matmul %88, %89, %cst_23 {dimension_numbers = #tpu.dot_dimension_numbers<[1], [0], [0], [1], [0, 0, 1, 1], [], []>} : vector<8x32xbf16>, vector<32x128xbf16>, vector<8x128xf32> -> vector<8x128xf32>
    %cst_24 = arith.constant 0.000000e+00 : f32
    %91 = vector.broadcast %cst_24 : f32 to vector<8x128xf32>
    %92 = arith.cmpf oge, %90, %91 : vector<8x128xf32>
    %cst_25 = arith.constant 0.00999999977 : f32
    %93 = vector.broadcast %cst_25 : f32 to vector<8x128xf32>
    %94 = arith.mulf %93, %90 : vector<8x128xf32>
    %95 = arith.select %92, %90, %94 : vector<8x128xi1>, vector<8x128xf32>
    %96 = arith.addf %57, %95 : vector<8x128xf32>
    %c0_26 = arith.constant 0 : index
    %c0_27 = arith.constant 0 : index
    %c0_28 = arith.constant 0 : index
    %97 = vector.load %arg4[%c0_26, %c0_27, %c0_28] : memref<1x8x128xf32, #tpu.memory_space<vmem>>, vector<1x8x128xf32>
    %98 = vector.shape_cast %97 : vector<1x8x128xf32> to vector<8x128xf32>
    %99 = vector.shape_cast %96 : vector<8x128xf32> to vector<1x8x128xf32>
    tpu.vector_store %arg4[%c0_26, %c0_27, %c0_28], %99 {strides = array<i32>} : memref<1x8x128xf32, #tpu.memory_space<vmem>>, vector<1x8x128xf32>,
    %c0_29 = arith.constant 0 : index
    %c0_30 = arith.constant 0 : index
    %c0_31 = arith.constant 0 : index
    %100 = vector.load %arg5[%c0_29, %c0_30, %c0_31] : memref<1x8x128xf32, #tpu.memory_space<vmem>>, vector<1x8x128xf32>
    %101 = vector.shape_cast %100 : vector<1x8x128xf32> to vector<8x128xf32>
    %102 = vector.shape_cast %66 : vector<8x128xf32> to vector<1x8x128xf32>
    tpu.vector_store %arg5[%c0_29, %c0_30, %c0_31], %102 {strides = array<i32>} : memref<1x8x128xf32, #tpu.memory_space<vmem>>, vector<1x8x128xf32>,
    return
  }
  func.func @transform_0(%arg0: i32) -> (i32, i32, i32) {
    %c0_i32 = arith.constant 0 : i32
    %c0_i32_0 = arith.constant 0 : i32
    %c0_i32_1 = arith.constant 0 : i32
    return %arg0, %c0_i32, %c0_i32_0 : i32, i32, i32
  }
  func.func @transform_1(%arg0: i32) -> (i32, i32, i32) {
    %c0_i32 = arith.constant 0 : i32
    %c0_i32_0 = arith.constant 0 : i32
    %c0_i32_1 = arith.constant 0 : i32
    return %arg0, %c0_i32, %c0_i32_0 : i32, i32, i32
  }
  func.func @transform_2(%arg0: i32) -> (i32, i32, i32) {
    %c0_i32 = arith.constant 0 : i32
    %c0_i32_0 = arith.constant 0 : i32
    %c0_i32_1 = arith.constant 0 : i32
    %c0_i32_2 = arith.constant 0 : i32
    return %c0_i32, %c0_i32_0, %c0_i32_1 : i32, i32, i32
  }
  func.func @transform_3(%arg0: i32) -> (i32, i32, i32) {
    %c0_i32 = arith.constant 0 : i32
    %c0_i32_0 = arith.constant 0 : i32
    %c0_i32_1 = arith.constant 0 : i32
    return %arg0, %c0_i32, %c0_i32_0 : i32, i32, i32
  }
  func.func @transform_4(%arg0: i32) -> (i32, i32, i32) {
    %c0_i32 = arith.constant 0 : i32
    %c0_i32_0 = arith.constant 0 : i32
    %c0_i32_1 = arith.constant 0 : i32
    return %arg0, %c0_i32, %c0_i32_0 : i32, i32, i32
  }
}

</mosaic_0001>

<bundles_post_ra>
// kernel: tpu_custom_call.1
= control target key start
LH: loop header
LB: loop body
LE: loop exit
PB: predicated region body
PF: predicated region fallthrough
CT: control target
= control target key end

     0   :  { %10 = vsyncpa [#allocation3], 0  ;;  %s1048_s0 = inlined_call_operand.vmem [shape: f32[2,8,128], index: 0, kind: input, shape index: {}]   ;;  %s1049_s1 = inlined_call_operand.hbm [shape: f32[2,8,128], index: 1, kind: input, shape index: {}, may-alias: {1,4}]   ;;  %s1050_s2 = inlined_call_operand.vmem [shape: bf16[2,8,32], index: 2, kind: input, shape index: {}]   ;;  %s1051_s3 = inlined_call_operand.hbm [shape: f32[2,8,128], index: 3, kind: output, shape index: {0}]   ;;  %s1052_s4 = inlined_call_operand.hbm [shape: f32[2,8,128], index: 4, kind: output, shape index: {1}, may-alias: {1,4}]  }
   0x1   :  { %12 = vsyncpa [#allocation3 + $0x1], 0 }
   0x2   :  { %13 = vsyncpa [#allocation4], 0 }
   0x3   :  { %15 = vsyncpa [#allocation4 + $0x1], 0 }
   0x4   :  { %16 = vsyncpa [#allocation7], 0 }
   0x5   :  { %18 = vsyncpa [#allocation7 + $0x1], 0  ;;  %s824_s15 = smov 0   ;;  %s826_s16 = smov 0  }
   0x6   :  { %s828_s17 = smov 0   ;;  %s830_s18 = smov 0  }
   0x7 LB: > { %s845_s19 = sadd.s32 4294967295, %s783_s18   ;;  %s552_s20 = sadd.s32 4294967294, %s783_s18   ;;  %s783_s18 = sphi %s830_s18, %s1067_s18   ;;  %s779_s17 = sphi %s828_s17, %s1066_s17   ;;  %s775_s16 = sphi %s826_s16, %s1065_s16   ;;  %s771_s15 = sphi %s824_s15, %s1064_s15  }
   0x8   : > { %s849_s21 = sadd.s32 1, %s783_s18   ;;  %s57_s22 = sadd.s32 1, %s779_s17 }
   0x9   : > { %s54_s23 = ssub.s32 %s783_s18, %s849_s21  ;;  %p64_p0 = scmp.ne.s32.totalorder %s779_s17, %s775_s16 }
   0xa   : > { %p55_p1 = scmp.eq.s32.totalorder %s54_s23, 0  ;;  %p65_p2 = scmp.eq.s32.totalorder %s783_s18, 0 }
   0xb   : > { %p70_p3 = scmp.ne.s32.totalorder %s775_s16, %s771_s15  ;;  %p71_p4 = scmp.eq.s32.totalorder %s845_s19, 0 }
   0xc   : > { %s861_s24 = scalar_select %p55_p1, %s779_s17, %s57_s22  }
   0xd   : > { %p863_p5 = por %p65_p2, %p64_p0  ;;  %p867_p6 = por %p71_p4, %p70_p3 }
   0xe   : > { %p115_p7 = scmp.eq.s32.totalorder %s845_s19, 1  ;;  %p121_p8 = scmp.eq.s32.totalorder %s552_s20, 1 }
   0xf   : > { %p610_p10 = scmp.lt.s32.totalorder %s783_s18, 2  ;;  %s177_s29 = sand.u32 1, %s779_s17  }
  0x10   : > { %p874_p11 = por %p115_p7, %p64_p0  ;;  %p878_p12 = por %p121_p8, %p70_p3 }
  0x11   : > { %s556_s30 = sshll.u32 %s783_s18, 7  ;;  %s555_s5 = sshll.u32 %s177_s29, 3 }
  0x12   : > { %s1056_s27 = scalar_select %p874_p11, 1, 0 }
  0x13   : > { %s1057_s28 = scalar_select %p878_p12, 1, 0 }
  0x14   : > { %s887_s8 = scalar_lea.hbm %s1049_s1, %s556_s30  ;;  %s181_s9 = scalar_lea.vmem [#allocation2], %s555_s5 }
  0x15   : > { %s188_s10 = sshll.u32 %s181_s9, 4  ;;  %p891_p13 = pnand %p610_p10, %p863_p5  ;;  %s895_s10 = int_to_ptr.vmem [resolvable:$true] %s188_s10 }
  0x16   : > { %s178_s12 = scalar_lea.sflag [#allocation3], %s177_s29  ;;  %s655_s13 = scalar_lea.hbm %s887_s8, 128 }
  0x17   : > { %p656_p2 = scmp.ne.s32.totalorder %s887_s8, %s655_s13  ;;  %p657_p3 = pneg %p891_p13 }
  0x18   : > { %s660_s22 = scalar_lea.hbm %s1049_s1, 256  ;;  %p661_p5 = scmp.lt.u32.totalorder %s887_s8, %s1049_s1 }
  0x19   : > { %p658_p4 = pnand %p657_p3, %p656_p2  ;;  %p662_p8 = scmp.lt.u32.totalorder %s660_s22, %s655_s13 }
  0x1a   : > { %p664_p9 = scmp.lt.u32.totalorder %s655_s13, %s887_s8 }
  0x1b   : > { %p659_p7 = pneg %p658_p4  ;;  %p663_p10 = por %p662_p8, %p661_p5 }
  0x1d   : > { %p665_p0 = por %p664_p9, %p663_p10 }
  0x1f   : > { %p666_p1 = pnand %p665_p0, %p659_p7 }
  0x21   : > { %669 = shalt.err (!%p666_p1)
}
  0x22   : > { %s670_s29 = scalar_lea.vmem %s895_s10, 128  ;;  %s785_s30 = smov [#allocation2]  }
  0x23   : > { %p671_p2 = scmp.ne.s32.totalorder %s895_s10, %s670_s29  ;;  %s675_s5 = sshll.u32 %s785_s30, 4  ;;  %s676_s5 = int_to_ptr.vmem [resolvable:$false] %s675_s5 }
  0x24   : > { %s677_s6 = scalar_lea.vmem %s676_s5, 256  ;;  %p678_p11 = scmp.lt.s32.totalorder %s895_s10, %s676_s5 }
  0x25   : > { %p673_p4 = pnand %p671_p2, %p657_p3  ;;  %p679_p5 = scmp.lt.s32.totalorder %s677_s6, %s670_s29 }
  0x27   : > { %p674_p12 = pneg %p673_p4  ;;  %p680_p8 = por %p679_p5, %p678_p11 }
  0x29   : > { %p681_p9 = pnand %p680_p8, %p674_p12 }
  0x2b   : > { %684 = shalt.err (!%p681_p9)
}
  0x2c   : > { %602 = dma.hbm_to_vmem [thread:$0]  (!%p891_p13), %s887_s8, 128, %s895_s10, %s178_s12  }
  0x2d   : > { %p1059_p0 = scmp.lt.s32.totalorder %s783_s18, 3  ;;  %p1060_p1 = scmp.ge.s32.totalorder %s783_s18, 1 }
  0x2f   : > { %p194_p3 = pnand %p1060_p1, %p1059_p0 }
  0x30   : > { %s929_s7 = sand.u32 (!%p194_p3), 1, %s775_s16  }
  0x31   : > { %197 = sbr.rel (%p194_p3) target bundleno = 770 (0x302), region = 32  ;;  %s932_s9 = sshll.u32 (!%p194_p3), %s929_s7, 3 }
  0x32   : > { %s200_s13 = scalar_lea.sflag (!%p194_p3), [#allocation3], %s929_s7  ;;  %s203_s11 = scalar_lea.vmem (!%p194_p3), [#allocation2], %s932_s9 }
  0x38   : > { %758 = dma.done.wait (%p867_p6), %s200_s13, 128  }
  0x39   : > { %760 = vsyncadd (%p867_p6), %s200_s13, 4294967168  ;;  %p237_p11 = scmp.lt.s32.totalorder %s845_s19, 1  ;;  %v786_v0 = vmov 0.0   ;;  %v257_v2 = vld [vmem:[%s203_s11] sm:$0xff]  ;;  %vm787_vm0 = vmmov 0   ;;  %s788_s26 = smov 2   ;;  %v242_v3 = vlaneseq }
  0x3a   : > { %577 = vmatprep.subr.bf16.mxu0 %v786_v0  ;;  %585 = vmatprep.subr.bf16.mxu1 %v786_v0  ;;  %s789_s22 = smov 127   ;;  %s790_s23 = smov 1   ;;  %v792_v12 = vmov 1.0   ;;  %v279_v14 = vld [vmem:[%s1050_s2] sm:$0xf]  ;;  %vm282_vm3 = vcmask 261120  }
  0x3b   : > { %s238_s8 = scalar_select %p237_p11, %s845_s19, 1  ;;  %581 = vmatprep.mubr.msk.bf16.mxu0 %vm787_vm0, %v786_v0  ;;  %589 = vmatprep.mubr.msk.bf16.mxu1 %vm787_vm0, %v786_v0  ;;  %v243_v4 = vand.u32 127, %v242_v3  ;;  %v563_v34 = vld [vmem:[%s1050_s2 + $0x4] sm:$0xf] }
  0x3c   : > { %274 = vrot.lane.b32.xlu1 %v257_v2, %s789_s22  ;;  %s791_s25 = smov 126   ;;  %s793_s5 = smov 124  }
  0x3d   : > { %s561_s10 = sshll.u32 %s238_s8, 3  ;;  %v248_v5 = vand.u32 15, %v243_v4  ;;  %s794_s6 = smov 118  }
  0x3e   : > { %s240_s20 = scalar_lea.vmem %s1048_s0, %s561_s10  ;;  %s795_s13 = smov 4  }
  0x3f   : > { %v256_v1 = vld [vmem:[%s240_s20] sm:$0xff]  ;;  %vm263_vm1 = vcmp.lt.s32.totalorder %v248_v5, 2  ;;  %vm277_vm2 = vcmp.lt.s32.totalorder %v248_v5, 1  ;;  %s796_s11 = smov 114   ;;  %vm344_vm5 = vcmp.lt.s32.totalorder %v248_v5, 4  ;;  %vm334_vm6 = vcmp.ge.s32.totalorder %v248_v5, 2 }
  0x40   : > { %266 = vrot.lane.b32.xlu0 %v256_v1, %s788_s26  ;;  %v281_v13 = vpack.c.bf16 %v792_v12, %v256_v1  ;;  %vm335_vm7 = vcmp.lt.s32.totalorder %v248_v5, 6  ;;  %s236_s8 = scalar_lea.vmem [#allocation6], %s932_s9  ;;  %s567_s14 = sshll.u32 %s845_s19, 7 }
  0x41   : > { %vm336_vm8 = vmand %vm334_vm6, %vm335_vm7  ;;  %s977_s22 = scalar_lea.hbm %s1052_s4, %s567_s14  ;;  %p1061_p12 = scmp.ne.s32.totalorder %s1056_s27, 0 }
  0x42   : > { %s797_s30 = smov [#allocation6]  }
  0x44   : > { %270 = vrot.lane.b32.xlu0 %v256_v1, %s790_s23  ;;  %s438_s23 = sshll.u32 %s236_s8, 4  ;;  %s439_s23 = int_to_ptr.vmem [resolvable:$true] %s438_s23 }
  0x45   : > { %s685_s29 = scalar_lea.vmem %s439_s23, 128 }
  0x46   : > { %p686_p6 = scmp.ne.s32.totalorder %s439_s23, %s685_s29 }
  0x48   : > { %341 = vrot.lane.b32.xlu0 %v257_v2, %s791_s25  ;;  %s412_s25 = scalar_lea.sflag [#allocation7], %s929_s7  ;;  %p687_p13 = pnand %p686_p6, %p1061_p12 }
  0x4a   : > { %p688_p7 = pneg %p687_p13 }
  0x4c   : > { %349 = vrot.lane.b32.xlu0 %v257_v2, %s793_s5  ;;  %s689_s5 = sshll.u32 %s797_s30, 4  ;;  %s690_s5 = int_to_ptr.vmem [resolvable:$false] %s689_s5 }
  0x4d   : > { %p692_p10 = scmp.lt.s32.totalorder %s439_s23, %s690_s5 }
  0xae   : > { %v275_v7 = vpop.permute.xlu1 %274 }
  0xb2   : > { %v267_v6 = vpop.permute.xlu0 %266 }
  0xb3   : > { %v269_v9 = vsel %vm263_vm1, %v257_v2, %v267_v6 }
  0xb6   : > { %v271_v8 = vpop.permute.xlu0 %270 }
  0xb7   : > { %v278_v10 = vsel %vm277_vm2, %v275_v7, %v271_v8 }
  0xb8   : > { %v280_v11 = vpack.c.bf16 %v278_v10, %v269_v9 }
  0xba   : > { %578 = vmatpush3.bf16.msra.mxu0 %v280_v11  ;;  %v342_v22 = vpop.permute.xlu0 %341 }
  0xbb   : > { %579 = vmatprep.subr.bf16.mxu0 %v786_v0 }
  0xbe   : > { %580 = vmatpush3.bf16.msra.mxu0 %v281_v13  ;;  %v350_v24 = vpop.permute.xlu0 %349 }
  0xc1   : > { %582 = vmatmul.mubr.msk.bf16.vlgmr.msra.gmra.mrb[0].mxu0 %vm282_vm3, %v279_v14 }
 0x194   : > { %v320_v15 = vpop.f32.mrb[0].mxu0 }
 0x195   : > { %vm326_vm4 = vcmp.ge.f32.partialorder %v320_v15, 0.0  ;;  %v327_v16 = vmul.f32 0.01, %v320_v15  ;;  %v583_v17 = vpop.f32.mrb[1].mxu0 }
 0x196   : > { %v323_v18 = vpop.f32.mrb[2].mxu0 }
 0x197   : > { %v328_v19 = vsel %vm326_vm4, %v320_v15, %v327_v16  ;;  %v584_v20 = vpop.f32.mrb[3].mxu0 }
 0x198   : > { %v956_v21 = vadd.f32 %v328_v19, %v256_v1 }
 0x19a   : > { %331 = vrot.lane.b32.xlu0 %v956_v21, %s794_s6  ;;  %338 = vrot.lane.b32.xlu1 %v956_v21, %s795_s13  ;;  %v356_v33 = vpack.c.bf16 %v792_v12, %v956_v21  ;;  %s691_s6 = scalar_lea.vmem %s690_s5, 256 }
 0x19b   : > { %p693_p2 = scmp.lt.s32.totalorder %s691_s6, %s685_s29 }
 0x19d   : > { %p694_p4 = por %p693_p2, %p692_p10 }
 0x19e   : > { %346 = vrot.lane.b32.xlu1 %v956_v21, %s788_s26 }
 0x19f   : > { %p695_p5 = pnand %p694_p4, %p688_p7 }
 0x1a2   : > { %259 = vrot.lane.b32.xlu1 %v256_v1, %s796_s11 }
 0x20c   : > { %v339_v23 = vpop.permute.xlu1 %338  ;;  %v332_v30 = vpop.permute.xlu0 %331 }
 0x20d   : > { %v345_v26 = vsel %vm344_vm5, %v342_v22, %v339_v23 }
 0x210   : > { %v347_v25 = vpop.permute.xlu1 %346 }
 0x211   : > { %v352_v27 = vsel %vm263_vm1, %v350_v24, %v347_v25 }
 0x212   : > { %v355_v28 = vpack.c.bf16 %v352_v27, %v345_v26 }
 0x214   : > { %586 = vmatpush3.bf16.msra.mxu1 %v355_v28  ;;  %v260_v29 = vpop.permute.xlu1 %259 }
 0x215   : > { %v265_v31 = vsel %vm263_vm1, %v260_v29, 0.0  ;;  %587 = vmatprep.subr.bf16.mxu1 %v786_v0 }
 0x216   : > { %v337_v32 = vsel %vm336_vm8, %v332_v30, %v265_v31 }
 0x217   : > { %405 = vst [vmem:[%s236_s8] sm:$0xff] %v337_v32 }
 0x218   : > { %588 = vmatpush3.bf16.msra.mxu1 %v356_v33 }
 0x21b   : > { %590 = vmatmul.mubr.msk.bf16.vlgmr.msra.gmra.mrb[0].mxu1 %vm282_vm3, %v563_v34 }
 0x21c   : > { %698 = shalt.err (!%p695_p5)
}
 0x21d   : > { %s699_s13 = scalar_lea.hbm %s977_s22, 128  ;;  %s703_s10 = scalar_lea.hbm %s1052_s4, 256 }
 0x21e   : > { %p700_p8 = scmp.ne.s32.totalorder %s977_s22, %s699_s13  ;;  %p704_p1 = scmp.lt.u32.totalorder %s977_s22, %s1052_s4 }
 0x21f   : > { %p705_p3 = scmp.lt.u32.totalorder %s703_s10, %s699_s13  ;;  %p707_p6 = scmp.lt.u32.totalorder %s699_s13, %s977_s22 }
 0x220   : > { %p701_p9 = pnand %p700_p8, %p1061_p12 }
 0x221   : > { %p706_p11 = por %p705_p3, %p704_p1 }
 0x222   : > { %p702_p0 = pneg %p701_p9 }
 0x223   : > { %p708_p13 = por %p707_p6, %p706_p11 }
 0x225   : > { %p709_p7 = pnand %p708_p13, %p702_p0 }
 0x227   : > { %712 = shalt.err (!%p709_p7)
}
 0x228   : > { %596 = dma.vmem_to_hbm [thread:$0]  (%p1061_p12), %s439_s23, 128, %s977_s22, %s412_s25  }
 0x229   : > { %s229_s26 = scalar_lea.vmem [#allocation5], %s932_s9  ;;  %s1004_s6 = scalar_lea.hbm %s1051_s3, %s567_s14 }
 0x22a   : > { %s425_s29 = sshll.u32 %s229_s26, 4  ;;  %s407_s22 = scalar_lea.sflag [#allocation4], %s929_s7  ;;  %s1006_s29 = int_to_ptr.vmem [resolvable:$true] %s425_s29 }
 0x22b   : > { %s713_s9 = scalar_lea.vmem %s1006_s29, 128  ;;  %s798_s23 = smov [#allocation5]  }
 0x22c   : > { %p714_p10 = scmp.ne.s32.totalorder %s1006_s29, %s713_s9  ;;  %s717_s25 = sshll.u32 %s798_s23, 4  ;;  %s718_s25 = int_to_ptr.vmem [resolvable:$false] %s717_s25 }
 0x22d   : > { %s719_s19 = scalar_lea.vmem %s718_s25, 256  ;;  %p720_p5 = scmp.lt.s32.totalorder %s1006_s29, %s718_s25 }
 0x22e   : > { %p715_p2 = pnand %p714_p10, %p1061_p12  ;;  %p721_p8 = scmp.lt.s32.totalorder %s719_s19, %s713_s9 }
 0x230   : > { %p716_p4 = pneg %p715_p2  ;;  %p722_p9 = por %p721_p8, %p720_p5 }
 0x232   : > { %p723_p0 = pnand %p722_p9, %p716_p4 }
 0x2ee   : > { %v394_v35 = vpop.f32.mrb[0].mxu1 }
 0x2ef   : > { %vm400_vm9 = vcmp.ge.f32.partialorder %v394_v35, 0.0  ;;  %v401_v36 = vmul.f32 0.01, %v394_v35  ;;  %v591_v37 = vpop.f32.mrb[1].mxu1 }
 0x2f0   : > { %v397_v38 = vpop.f32.mrb[2].mxu1 }
 0x2f1   : > { %v402_v39 = vsel %vm400_vm9, %v394_v35, %v401_v36  ;;  %v592_v40 = vpop.f32.mrb[3].mxu1 }
 0x2f2   : > { %v403_v41 = vadd.f32 %v402_v39, %v956_v21 }
 0x2f4   : > { %404 = vst [vmem:[%s229_s26] sm:$0xff] %v403_v41 }
 0x2f5   : > { %726 = shalt.err (!%p723_p0)
}
 0x2f6   : > { %s727_s7 = scalar_lea.hbm %s1004_s6, 128  ;;  %s731_s11 = scalar_lea.hbm %s1051_s3, 256 }
 0x2f7   : > { %p728_p1 = scmp.ne.s32.totalorder %s1004_s6, %s727_s7  ;;  %p732_p6 = scmp.lt.u32.totalorder %s1004_s6, %s1051_s3 }
 0x2f8   : > { %p733_p13 = scmp.lt.u32.totalorder %s731_s11, %s727_s7  ;;  %p735_p10 = scmp.lt.u32.totalorder %s727_s7, %s1004_s6 }
 0x2f9   : > { %p729_p3 = pnand %p728_p1, %p1061_p12 }
 0x2fa   : > { %p734_p7 = por %p733_p13, %p732_p6 }
 0x2fb   : > { %p730_p11 = pneg %p729_p3 }
 0x2fc   : > { %p736_p2 = por %p735_p10, %p734_p7 }
 0x2fe   : > { %p737_p4 = pnand %p736_p2, %p730_p11 }
 0x300   : > { %740 = shalt.err (!%p737_p4)
}
 0x301   : > { %595 = dma.vmem_to_hbm [thread:$0]  (%p1061_p12), %s1006_s29, 128, %s1004_s6, %s407_s22  }
 0x302 PF: > { %s450_s12 = sand.u32 1, %s771_s15   ;;  %p1062_p5 = scmp.ne.s32.totalorder %s1057_s28, 0 }
 0x303   : > { %p1063_p8 = scmp.ge.s32.totalorder %s783_s18, 2  ;;  %s451_s20 = scalar_lea.sflag [#allocation4], %s450_s12 }
 0x305   : > { %p604_p9 = pnand %p1063_p8, %p1062_p5 }
 0x307   : > { %762 = dma.done.wait (!%p604_p9), %s451_s20, 128  }
 0x308   : > { %764 = vsyncadd (!%p604_p9), %s451_s20, 4294967168  ;;  %s460_s26 = scalar_lea.sflag [#allocation7], %s450_s12 }
 0x309   : > { %766 = dma.done.wait (!%p604_p9), %s460_s26, 128  }
 0x30a   : > { %768 = vsyncadd (!%p604_p9), %s460_s26, 4294967168  ;;  %p21_p12 = scmp.ge.s32.totalorder %s849_s21, 4   ;;  %s1064_s15 = smov %s775_s16 }
 0x30b   : > { %s1065_s16 = smov %s779_s17  ;;  %s1066_s17 = smov %s861_s24 }
 0x30c   : > { %s1067_s18 = smov %s849_s21  ;;  %23 = sbr.rel (!%p21_p12) target bundleno = 7 (0x7), region = 98 }
 0x313   :  { %465 = vsyncpa [#allocation3], 1 }
 0x314   :  { %467 = vsyncpa [#allocation3 + $0x1], 1 }
 0x315   :  { %468 = vsyncpa [#allocation4], 1 }
 0x316   :  { %470 = vsyncpa [#allocation4 + $0x1], 1 }
 0x317   :  { %471 = vsyncpa [#allocation7], 1 }
 0x318   :  { %473 = vsyncpa [#allocation7 + $0x1], 1 }

</bundles_post_ra>
